<compile_context>
chip_gen: v7x
topology: tpu7x:2x2x1
jax: 0.10.0
libtpu: 0.0.40
codegen_flags: <defaults>
</compile_context>

<pallas_src>
import functools

import jax
import jax.numpy as jnp
from jax.experimental import pallas as pl
from jax.experimental.pallas import tpu as pltpu


# Budget for our four block buffers (2x double-buffered input + 2x output),
# counted with lane padding.  28 MiB fits under v7x's ~40 MiB guidance and well
# under v5e/v6e physical VMEM once the scoped limit is raised.
_VMEM_BLOCK_BUDGET = 28 * 1024 * 1024
_VMEM_LIMIT_BYTES = 40 * 1024 * 1024
_MIN_GRID_STEPS = 8


def _gap_kernel(x_ref, o_ref, *, inv_hw):
    # x_ref: (TR, HW) tile of the flattened (N*C, H*W) input (native dtype).
    # o_ref: (TR, 1) tile of per-row means.
    # dtype-fused f32 accumulation: no full-tile f32 temporary.
    s = jnp.sum(x_ref[...], axis=-1, keepdims=True, dtype=jnp.float32)  # (TR, 1)
    o_ref[...] = (s * inv_hw).astype(o_ref.dtype)


def _round_up(v, m):
    return (v + m - 1) // m * m


def _sublane_tile(dtype):
    # Native packed sublane tile: 8 for 4-byte, 16 for 2-byte, 32 for 1-byte.
    return max(8, 32 // jnp.dtype(dtype).itemsize)


def global_avg_pool2d(x):
    """x: (N, C, H, W) -> (N, C), mean over H and W."""
    N, C, H, W = x.shape
    NC, HW = N * C, H * W
    itemsize = jnp.dtype(x.dtype).itemsize
    sub = _sublane_tile(x.dtype)

    # Zero-cost flatten: rows are (n, c) pairs, lanes are the H*W spatial axis.
    x2d = x.reshape(NC, HW)

    # --- Padded-aware VMEM accounting (per row, per buffer) -------------------
    in_row_bytes = _round_up(HW, 128) * itemsize     # input block lane-padded
    out_row_bytes = 128 * itemsize                   # (TR, 1) block padded to 128 lanes
    bytes_per_row = 2 * (in_row_bytes + out_row_bytes)  # x2 for double buffering

    nc_tiles = pl.cdiv(NC, sub)                      # row-tiles of `sub` rows each
    cap_tiles = max(1, _VMEM_BLOCK_BUDGET // (bytes_per_row * sub))
    # NOTE: if even `sub` rows exceeded the budget (absurdly large H*W) the
    # spatial axis would need its own accumulated grid axis; realistic GAP
    # inputs (darknet: 7x7 / 13x13) never come close.

    # --- Grid sizing: biggest tile that fits VMEM, but >= min(8, nc_tiles)
    #     steps so the DMA/compute pipeline actually overlaps. ----------------
    min_steps = min(_MIN_GRID_STEPS, nc_tiles)
    tr_tiles = max(1, min(cap_tiles, nc_tiles // min_steps))
    g = pl.cdiv(nc_tiles, tr_tiles)
    # Best-effort even step count (v7x shards the parallel axis across 2 TCs).
    if g > 1 and g % 2:
        for t in range(tr_tiles - 1, max(0, tr_tiles - 64), -1):
            if pl.cdiv(nc_tiles, t) % 2 == 0:
                tr_tiles = t
                g = pl.cdiv(nc_tiles, t)
                break

    TR = tr_tiles * sub
    G = pl.cdiv(NC, TR)
    # Ragged last row-block: OOB input rows are read as unspecified padding;
    # rows are independent, their results land in output rows >= NC and are
    # sliced away below.

    out = pl.pallas_call(
        functools.partial(_gap_kernel, inv_hw=1.0 / HW),
        out_shape=jax.ShapeDtypeStruct((G * TR, 1), x.dtype),
        grid_spec=pltpu.PrefetchScalarGridSpec(
            num_scalar_prefetch=0,
            grid=(G,),
            in_specs=[pl.BlockSpec((TR, HW), lambda i: (i, 0))],
            out_specs=pl.BlockSpec((TR, 1), lambda i: (i, 0)),
        ),
        compiler_params=pltpu.CompilerParams(
            dimension_semantics=("parallel",),
            vmem_limit_bytes=_VMEM_LIMIT_BYTES,
        ),
    )(x2d)

    return out[:NC, 0].reshape(N, C)


if __name__ == "__main__":
    key = jax.random.PRNGKey(0)

    # Primary check (shapes from the spec).
    N, C, H, W = 2, 4, 16, 16
    x = jax.random.normal(key, (N, C, H, W), dtype=jnp.float32)
    out = jax.block_until_ready(global_avg_pool2d(x))
    ref = jnp.mean(x, axis=(2, 3))
    assert out.shape == (N, C)
    assert jnp.allclose(out, ref, atol=1e-5, rtol=1e-5)

    # Ragged row-tile path (N*C not a multiple of 8, odd H*W, multi-step grid).
    k2 = jax.random.PRNGKey(1)
    x2 = jax.random.normal(k2, (2, 5, 7, 7), dtype=jnp.float32)
    out2 = jax.block_until_ready(global_avg_pool2d(x2))
    ref2 = jnp.mean(x2, axis=(2, 3))
    assert out2.shape == (2, 5)
    assert jnp.allclose(out2, ref2, atol=1e-5, rtol=1e-5)

    # bf16 path: exercises the 16-row packed sublane tile + f32-fused accumulation.
    k3 = jax.random.PRNGKey(2)
    x3 = jax.random.normal(k3, (3, 6, 7, 7), dtype=jnp.bfloat16)
    out3 = jax.block_until_ready(global_avg_pool2d(x3))
    ref3 = jnp.mean(x3.astype(jnp.float32), axis=(2, 3))
    assert out3.shape == (3, 6)
    assert jnp.allclose(out3.astype(jnp.float32), ref3, atol=2e-2, rtol=2e-2)

    print("KERNEL_OK")
</pallas_src>

<mosaic_0001>
module attributes {stable_mosaic.version = 11 : i64} {
  func.func @_gap_kernel(%arg0: i32, %arg1: memref<8x256xf32, #tpu.memory_space<vmem>>, %arg2: memref<8x1xf32, #tpu.memory_space<vmem>>) attributes {dimension_semantics = [#tpu.dimension_semantics<parallel>], iteration_bounds = array<i64: 1>, scalar_prefetch = 0 : i64, scratch_operands = 0 : i64, tpu.core_type = #tpu.core_type<tc>, window_params = [{transform_indices = @transform_0, window_bounds = array<i64: 8, 256>}, {transform_indices = @transform_1, window_bounds = array<i64: 8, 1>}]} {
    %c0 = arith.constant 0 : index
    %c0_0 = arith.constant 0 : index
    %0 = vector.load %arg1[%c0, %c0_0] : memref<8x256xf32, #tpu.memory_space<vmem>>, vector<8x256xf32>
    %cst = arith.constant dense<0.000000e+00> : vector<8xf32>
    %1 = vector.multi_reduction <add>, %0, %cst [1] : vector<8x256xf32> to vector<8xf32>
    %2 = vector.shape_cast %1 : vector<8xf32> to vector<8x1xf32>
    %cst_1 = arith.constant 3.906250e-03 : f32
    %3 = vector.broadcast %cst_1 : f32 to vector<8x1xf32>
    %4 = arith.mulf %2, %3 : vector<8x1xf32>
    %c0_2 = arith.constant 0 : index
    %c0_3 = arith.constant 0 : index
    %5 = vector.load %arg2[%c0_2, %c0_3] : memref<8x1xf32, #tpu.memory_space<vmem>>, vector<8x1xf32>
    tpu.vector_store %arg2[%c0_2, %c0_3], %4 {strides = array<i32>} : memref<8x1xf32, #tpu.memory_space<vmem>>, vector<8x1xf32>,
    return
  }
  func.func @transform_0(%arg0: i32) -> (i32, i32) {
    %c0_i32 = arith.constant 0 : i32
    %c0_i32_0 = arith.constant 0 : i32
    return %arg0, %c0_i32 : i32, i32
  }
  func.func @transform_1(%arg0: i32) -> (i32, i32) {
    %c0_i32 = arith.constant 0 : i32
    %c0_i32_0 = arith.constant 0 : i32
    return %arg0, %c0_i32 : i32, i32
  }
}

</mosaic_0001>

<bundles_post_ra>
// kernel: tpu_custom_call.1
= control target key start
LH: loop header
LB: loop body
LE: loop exit
PB: predicated region body
PF: predicated region fallthrough
CT: control target
= control target key end

     0   :  { %6 = vsyncpa [#allocation3], 0  ;;  %s58_s6 = smov [#allocation2]   ;;  %s84_s0 = inlined_call_operand.hbm [shape: f32[8,256], index: 0, kind: input, shape index: {}]   ;;  %s85_s1 = inlined_call_operand.vmem [shape: f32[8,1], index: 1, kind: output, shape index: {}]  }
   0x1   :  { %s13_s7 = sshll.u32 %s58_s6, 4  ;;  %s34_s10 = scalar_lea.hbm %s84_s0, 256  ;;  %s14_s7 = int_to_ptr.vmem [resolvable:$true] %s13_s7 }
   0x2   :  { %p35_p0 = scmp.ne.s32.totalorder %s84_s0, %s34_s10  ;;  %p38_p1 = scmp.lt.u32.totalorder %s34_s10, %s84_s0 }
   0x4   :  { %p40_p2 = pnand %p38_p1, %p35_p0 }
   0x6   :  { %43 = shalt.err (!%p40_p2)
}
   0x7   :  { %s44_s15 = scalar_lea.vmem %s14_s7, 256  ;;  %p49_p4 = scmp.lt.s32.totalorder %s14_s7, %s14_s7 }
   0x8   :  { %p45_p3 = scmp.ne.s32.totalorder %s14_s7, %s44_s15  ;;  %p50_p5 = scmp.lt.s32.totalorder %s44_s15, %s44_s15 }
   0xa   :  { %p51_p6 = por %p50_p5, %p49_p4 }
   0xc   :  { %p52_p7 = pnand %p51_p6, %p45_p3 }
   0xe   :  { %55 = shalt.err (!%p52_p7)
}
   0xf   :  { %16 = dma.hbm_to_vmem [thread:$0]  %s84_s0, 256, %s14_s7, [#allocation3]  }
  0x10   :  { %56 = dma.done.wait [#allocation3], 256  }
  0x11   :  { %57 = vsyncadd [#allocation3], 4294967040  ;;  %v20_v0 = vld [vmem:[#allocation2] sm:$0xff]  ;;  %v21_v1 = vld [vmem:[#allocation2 + $0x8] sm:$0xff]  ;;  %vm26_vm0 = vcmask 7168  }
  0x12   :  { %v22_v2 = vadd.f32 %v21_v1, %v20_v0 }
  0x14   :  { %23 = vadd.xlane.f32.xlu0 %v22_v2 }
  0xa1   :  { %v24_v3 = vpop.xlane.xlu0 %23 }
  0xa2   :  { %v25_v4 = vmul.f32 0.00390625, %v24_v3 }
  0xa4   :  { %27 = vst.msk [vmem:[%s85_s1] sm:$0xff] %vm26_vm0, %v25_v4 }
  0xa5   :  { %32 = vsyncpa [#allocation3], 1 }

</bundles_post_ra>
